<compile_context>
chip_gen: v7x
topology: tpu7x:2x2x1
jax: 0.10.0
libtpu: 0.0.40
codegen_flags: <defaults>
</compile_context>

<pallas_src>
import functools

import jax
import jax.numpy as jnp
from jax import lax
from jax.experimental import pallas as pl
from jax.experimental.pallas import tpu as pltpu

EPS = 1e-5  # PyTorch BatchNorm2d default


def _round_up(x, m):
    return (x + m - 1) // m * m


# --------------------------------------------------------------------------
# Pallas kernel: im2col conv (single MXU matmul) + partial BN statistics
# --------------------------------------------------------------------------
def _conv_im2col_kernel(p_ref, w_ref, b_ref, y_ref, stats_ref, *, m_valid, tm):
    """One row-tile of the im2col'ed 3x3 convolution.

    p_ref     : (TM, K)     bf16  im2col patches, K = 9*Cin
    w_ref     : (K, Cp)     bf16  flattened conv weights, channel-padded to Cp
    b_ref     : (1, Cp)     f32   bias, channel-padded
    y_ref     : (TM, Cp)    f32   conv output (pre-BN), lane-dense
    stats_ref : (1, 2, Cp)  f32   this tile's [sum, sum-of-squares] (BN stats)
    """
    # Single K-folded matmul on the MXU: bf16 inputs, f32 accumulation.
    acc = jnp.dot(p_ref[...], w_ref[...], preferred_element_type=jnp.float32)
    acc = acc + b_ref[...]
    y_ref[...] = acc

    # Per-tile partial batch-norm statistics; rows beyond the valid M (grid
    # padding) are masked out. Mask is skipped entirely when M % TM == 0.
    if m_valid % tm == 0:
        av = acc
    else:
        row0 = pl.program_id(0) * tm
        rid = row0 + lax.broadcasted_iota(jnp.int32, acc.shape, 0)
        av = jnp.where(rid < m_valid, acc, 0.0)
    s = jnp.sum(av, axis=0, keepdims=True)         # (1, Cp)
    ss = jnp.sum(av * av, axis=0, keepdims=True)   # (1, Cp)
    stats_ref[...] = jnp.concatenate([s, ss], axis=0).reshape(1, 2, -1)


def conv3x3_im2col(patches, w_hwio, b, *, tm=256):
    """patches: (M, 9*Cin). Returns (y: (M, Cout) f32 pre-BN, stats: (2, Cout))."""
    M, K = patches.shape
    Cout = w_hwio.shape[-1]
    Cp = _round_up(Cout, 128)                      # lane-dense output channels

    wf = jnp.pad(w_hwio.reshape(K, Cout).astype(jnp.bfloat16),
                 ((0, 0), (0, Cp - Cout)))
    bp = jnp.pad(b.astype(jnp.float32), (0, Cp - Cout)).reshape(1, Cp)

    g = int(pl.cdiv(M, tm))
    mp = g * tm
    if mp != M:
        patches = jnp.pad(patches, ((0, mp - M), (0, 0)))
    patches = patches.astype(jnp.bfloat16)         # halve HBM/VMEM traffic

    y, stats = pl.pallas_call(
        functools.partial(_conv_im2col_kernel, m_valid=M, tm=tm),
        out_shape=(jax.ShapeDtypeStruct((mp, Cp), jnp.float32),
                   jax.ShapeDtypeStruct((g, 2, Cp), jnp.float32)),
        grid=(g,),
        in_specs=[
            pl.BlockSpec((tm, K), lambda i: (i, 0)),
            pl.BlockSpec((K, Cp), lambda i: (0, 0)),
            pl.BlockSpec((1, Cp), lambda i: (0, 0)),
        ],
        out_specs=(
            pl.BlockSpec((tm, Cp), lambda i: (i, 0)),
            pl.BlockSpec((1, 2, Cp), lambda i: (i, 0, 0)),  # per-step partial stats
        ),
        compiler_params=pltpu.CompilerParams(
            dimension_semantics=("parallel",),      # safe: disjoint blocks per step
            vmem_limit_bytes=32 * 1024 * 1024),
    )(patches, wf, bp)

    stats = jnp.sum(stats, axis=0)                  # (2, Cp) reduce partials in JAX
    return y[:M, :Cout], stats[:, :Cout]


# --------------------------------------------------------------------------
# Wrapper-side im2col (XLA gather; ordering matches w.reshape(9*Cin, Cout))
# --------------------------------------------------------------------------
def _im2col_3x3(x_nhwc):
    """(N, H, W, C) -> (N*H*W, 9*C) patches for a 3x3 SAME conv (zero padding)."""
    N, H, W, C = x_nhwc.shape
    xp = jnp.pad(x_nhwc, ((0, 0), (1, 1), (1, 1), (0, 0)))
    cols = [xp[:, dh:dh + H, dw:dw + W, :] for dh in range(3) for dw in range(3)]
    return jnp.concatenate(cols, axis=-1).reshape(N * H * W, 9 * C)


# --------------------------------------------------------------------------
# double_conv forward (NCHW in, NCHW out)
# --------------------------------------------------------------------------
def double_conv_forward(x_nchw, params, *, tm=256):
    x = jnp.transpose(x_nchw, (0, 2, 3, 1)).astype(jnp.float32)   # NCHW -> NHWC
    N, H, W, _ = x.shape
    cnt = float(N * H * W)

    def layer(a_nhwc, w, b, gamma, beta):
        Cout = w.shape[-1]
        patches = _im2col_3x3(a_nhwc)
        y, stats = conv3x3_im2col(patches, w, b, tm=tm)           # y: (M, Cout) f32
        mean = stats[0] / cnt
        var = stats[1] / cnt - mean * mean   # biased batch variance (BN training mode)
        scale = gamma * lax.rsqrt(var + EPS)
        shift = beta - mean * scale
        # BN-apply + ReLU: pure elementwise -> left to XLA, which fuses it with the
        # next layer's im2col (or the final transpose). No separate Pallas pass.
        a = jnp.maximum(y * scale + shift, 0.0)
        return a.reshape(N, H, W, Cout)

    a1 = layer(x, params["w1"], params["b1"], params["g1"], params["be1"])
    a2 = layer(a1, params["w2"], params["b2"], params["g2"], params["be2"])
    return jnp.transpose(a2, (0, 3, 1, 2))                        # NHWC -> NCHW


# --------------------------------------------------------------------------
# Pure-JAX (f32) reference for correctness checking
# --------------------------------------------------------------------------
def reference_forward(x_nchw, params):
    x = jnp.transpose(x_nchw, (0, 2, 3, 1)).astype(jnp.float32)

    def conv(x, w, b):
        y = lax.conv_general_dilated(
            x, w, (1, 1), "SAME",
            dimension_numbers=("NHWC", "HWIO", "NHWC"))
        return y + b

    def bn_relu_ref(y, gamma, beta):
        mean = jnp.mean(y, axis=(0, 1, 2))
        var = jnp.var(y, axis=(0, 1, 2))
        return jnp.maximum((y - mean) / jnp.sqrt(var + EPS) * gamma + beta, 0.0)

    a1 = bn_relu_ref(conv(x, params["w1"], params["b1"]),
                     params["g1"], params["be1"])
    a2 = bn_relu_ref(conv(a1, params["w2"], params["b2"]),
                     params["g2"], params["be2"])
    return jnp.transpose(a2, (0, 3, 1, 2))


if __name__ == "__main__":
    in_ch, out_ch = 4, 8
    N, H, W = 2, 16, 16

    key = jax.random.PRNGKey(0)
    kx, kw1, kb1, kw2, kb2 = jax.random.split(key, 5)

    # Deterministic init matching nn.Conv2d(.., 3, padding=1) shapes (stored HWIO)
    # and PyTorch BatchNorm2d affine init.
    bound1 = 1.0 / jnp.sqrt(in_ch * 9.0)
    bound2 = 1.0 / jnp.sqrt(out_ch * 9.0)
    params = {
        "w1": jax.random.uniform(kw1, (3, 3, in_ch, out_ch), jnp.float32,
                                 -bound1, bound1),
        "b1": jax.random.uniform(kb1, (out_ch,), jnp.float32, -bound1, bound1),
        "g1": jnp.ones((out_ch,), jnp.float32),
        "be1": jnp.zeros((out_ch,), jnp.float32),
        "w2": jax.random.uniform(kw2, (3, 3, out_ch, out_ch), jnp.float32,
                                 -bound2, bound2),
        "b2": jax.random.uniform(kb2, (out_ch,), jnp.float32, -bound2, bound2),
        "g2": jnp.ones((out_ch,), jnp.float32),
        "be2": jnp.zeros((out_ch,), jnp.float32),
    }

    x = jax.random.normal(kx, (N, in_ch, H, W), jnp.float32)  # NCHW like PyTorch

    fwd = jax.jit(double_conv_forward)
    out = jax.block_until_ready(fwd(x, params))
    ref = jax.block_until_ready(reference_forward(x, params))

    assert out.shape == (N, out_ch, H, W), out.shape
    # Tolerance loosened vs rev 1 because the matmul inputs are bf16 (f32 accum),
    # per the performance review; reference is full f32.
    max_err = float(jnp.max(jnp.abs(out - ref)))
    assert jnp.allclose(out, ref, atol=3e-2, rtol=3e-2), max_err
    print("KERNEL_OK")
</pallas_src>

<mosaic_0001>
module attributes {stable_mosaic.version = 11 : i64} {
  func.func @_conv_im2col_kernel(%arg0: i32, %arg1: memref<256x36xbf16, #tpu.memory_space<vmem>>, %arg2: memref<36x128xbf16, #tpu.memory_space<vmem>>, %arg3: memref<1x128xf32, #tpu.memory_space<vmem>>, %arg4: memref<256x128xf32, #tpu.memory_space<vmem>>, %arg5: memref<1x2x128xf32, #tpu.memory_space<vmem>>) attributes {dimension_semantics = [#tpu.dimension_semantics<parallel>], iteration_bounds = array<i64: 2>, scalar_prefetch = 0 : i64, scratch_operands = 0 : i64, tpu.core_type = #tpu.core_type<tc>, window_params = [{transform_indices = @transform_0, window_bounds = array<i64: 256, 36>}, {pipeline_mode = #tpu.pipeline_mode<synchronous>, transform_indices = @transform_1, window_bounds = array<i64: 36, 128>}, {pipeline_mode = #tpu.pipeline_mode<synchronous>, transform_indices = @transform_2, window_bounds = array<i64: 1, 128>}, {transform_indices = @transform_3, window_bounds = array<i64: 256, 128>}, {transform_indices = @transform_4, window_bounds = array<i64: 1, 2, 128>}]} {
    %c0 = arith.constant 0 : index
    %c0_0 = arith.constant 0 : index
    %0 = vector.load %arg1[%c0, %c0_0] : memref<256x36xbf16, #tpu.memory_space<vmem>>, vector<256x36xbf16>
    %c0_1 = arith.constant 0 : index
    %c0_2 = arith.constant 0 : index
    %1 = vector.load %arg2[%c0_1, %c0_2] : memref<36x128xbf16, #tpu.memory_space<vmem>>, vector<36x128xbf16>
    %cst = arith.constant dense<0.000000e+00> : vector<256x128xf32>
    %2 = tpu.matmul %0, %1, %cst {dimension_numbers = #tpu.dot_dimension_numbers<[1], [0], [0], [1], [0, 0, 1, 1], [], []>} : vector<256x36xbf16>, vector<36x128xbf16>, vector<256x128xf32> -> vector<256x128xf32>
    %c0_3 = arith.constant 0 : index
    %c0_4 = arith.constant 0 : index
    %3 = vector.load %arg3[%c0_3, %c0_4] : memref<1x128xf32, #tpu.memory_space<vmem>>, vector<1x128xf32>
    %4 = vector.broadcast %3 : vector<1x128xf32> to vector<256x128xf32>
    %5 = arith.addf %2, %4 : vector<256x128xf32>
    %c0_5 = arith.constant 0 : index
    %c0_6 = arith.constant 0 : index
    %6 = vector.load %arg4[%c0_5, %c0_6] : memref<256x128xf32, #tpu.memory_space<vmem>>, vector<256x128xf32>
    tpu.vector_store %arg4[%c0_5, %c0_6], %5 {strides = array<i32>} : memref<256x128xf32, #tpu.memory_space<vmem>>, vector<256x128xf32>,
    %cst_7 = arith.constant dense<0.000000e+00> : vector<128xf32>
    %7 = vector.multi_reduction <add>, %5, %cst_7 [0] : vector<256x128xf32> to vector<128xf32>
    %8 = vector.shape_cast %7 : vector<128xf32> to vector<1x128xf32>
    %9 = arith.mulf %5, %5 : vector<256x128xf32>
    %cst_8 = arith.constant dense<0.000000e+00> : vector<128xf32>
    %10 = vector.multi_reduction <add>, %9, %cst_8 [0] : vector<256x128xf32> to vector<128xf32>
    %11 = vector.shape_cast %10 : vector<128xf32> to vector<1x128xf32>
    %12 = tpu.concatenate %8, %11 in 0 : vector<1x128xf32>, vector<1x128xf32> -> vector<2x128xf32>
    %13 = vector.shape_cast %12 : vector<2x128xf32> to vector<1x2x128xf32>
    %c0_9 = arith.constant 0 : index
    %c0_10 = arith.constant 0 : index
    %c0_11 = arith.constant 0 : index
    %14 = vector.load %arg5[%c0_9, %c0_10, %c0_11] : memref<1x2x128xf32, #tpu.memory_space<vmem>>, vector<1x2x128xf32>
    tpu.vector_store %arg5[%c0_9, %c0_10, %c0_11], %13 {strides = array<i32>} : memref<1x2x128xf32, #tpu.memory_space<vmem>>, vector<1x2x128xf32>,
    return
  }
  func.func @transform_0(%arg0: i32) -> (i32, i32) {
    %c0_i32 = arith.constant 0 : i32
    %c0_i32_0 = arith.constant 0 : i32
    return %arg0, %c0_i32 : i32, i32
  }
  func.func @transform_1(%arg0: i32) -> (i32, i32) {
    %c0_i32 = arith.constant 0 : i32
    %c0_i32_0 = arith.constant 0 : i32
    %c0_i32_1 = arith.constant 0 : i32
    return %c0_i32, %c0_i32_0 : i32, i32
  }
  func.func @transform_2(%arg0: i32) -> (i32, i32) {
    %c0_i32 = arith.constant 0 : i32
    %c0_i32_0 = arith.constant 0 : i32
    %c0_i32_1 = arith.constant 0 : i32
    return %c0_i32, %c0_i32_0 : i32, i32
  }
  func.func @transform_3(%arg0: i32) -> (i32, i32) {
    %c0_i32 = arith.constant 0 : i32
    %c0_i32_0 = arith.constant 0 : i32
    return %arg0, %c0_i32 : i32, i32
  }
  func.func @transform_4(%arg0: i32) -> (i32, i32, i32) {
    %c0_i32 = arith.constant 0 : i32
    %c0_i32_0 = arith.constant 0 : i32
    %c0_i32_1 = arith.constant 0 : i32
    return %arg0, %c0_i32, %c0_i32_0 : i32, i32, i32
  }
}

module attributes {stable_mosaic.version = 11 : i64} {
  func.func @_conv_im2col_kernel(%arg0: i32, %arg1: memref<256x72xbf16, #tpu.memory_space<vmem>>, %arg2: memref<72x128xbf16, #tpu.memory_space<vmem>>, %arg3: memref<1x128xf32, #tpu.memory_space<vmem>>, %arg4: memref<256x128xf32, #tpu.memory_space<vmem>>, %arg5: memref<1x2x128xf32, #tpu.memory_space<vmem>>) attributes {dimension_semantics = [#tpu.dimension_semantics<parallel>], iteration_bounds = array<i64: 2>, scalar_prefetch = 0 : i64, scratch_operands = 0 : i64, tpu.core_type = #tpu.core_type<tc>, window_params = [{transform_indices = @transform_0, window_bounds = array<i64: 256, 72>}, {pipeline_mode = #tpu.pipeline_mode<synchronous>, transform_indices = @transform_1, window_bounds = array<i64: 72, 128>}, {pipeline_mode = #tpu.pipeline_mode<synchronous>, transform_indices = @transform_2, window_bounds = array<i64: 1, 128>}, {transform_indices = @transform_3, window_bounds = array<i64: 256, 128>}, {transform_indices = @transform_4, window_bounds = array<i64: 1, 2, 128>}]} {
    %c0 = arith.constant 0 : index
    %c0_0 = arith.constant 0 : index
    %0 = vector.load %arg1[%c0, %c0_0] : memref<256x72xbf16, #tpu.memory_space<vmem>>, vector<256x72xbf16>
    %c0_1 = arith.constant 0 : index
    %c0_2 = arith.constant 0 : index
    %1 = vector.load %arg2[%c0_1, %c0_2] : memref<72x128xbf16, #tpu.memory_space<vmem>>, vector<72x128xbf16>
    %cst = arith.constant dense<0.000000e+00> : vector<256x128xf32>
    %2 = tpu.matmul %0, %1, %cst {dimension_numbers = #tpu.dot_dimension_numbers<[1], [0], [0], [1], [0, 0, 1, 1], [], []>} : vector<256x72xbf16>, vector<72x128xbf16>, vector<256x128xf32> -> vector<256x128xf32>
    %c0_3 = arith.constant 0 : index
    %c0_4 = arith.constant 0 : index
    %3 = vector.load %arg3[%c0_3, %c0_4] : memref<1x128xf32, #tpu.memory_space<vmem>>, vector<1x128xf32>
    %4 = vector.broadcast %3 : vector<1x128xf32> to vector<256x128xf32>
    %5 = arith.addf %2, %4 : vector<256x128xf32>
    %c0_5 = arith.constant 0 : index
    %c0_6 = arith.constant 0 : index
    %6 = vector.load %arg4[%c0_5, %c0_6] : memref<256x128xf32, #tpu.memory_space<vmem>>, vector<256x128xf32>
    tpu.vector_store %arg4[%c0_5, %c0_6], %5 {strides = array<i32>} : memref<256x128xf32, #tpu.memory_space<vmem>>, vector<256x128xf32>,
    %cst_7 = arith.constant dense<0.000000e+00> : vector<128xf32>
    %7 = vector.multi_reduction <add>, %5, %cst_7 [0] : vector<256x128xf32> to vector<128xf32>
    %8 = vector.shape_cast %7 : vector<128xf32> to vector<1x128xf32>
    %9 = arith.mulf %5, %5 : vector<256x128xf32>
    %cst_8 = arith.constant dense<0.000000e+00> : vector<128xf32>
    %10 = vector.multi_reduction <add>, %9, %cst_8 [0] : vector<256x128xf32> to vector<128xf32>
    %11 = vector.shape_cast %10 : vector<128xf32> to vector<1x128xf32>
    %12 = tpu.concatenate %8, %11 in 0 : vector<1x128xf32>, vector<1x128xf32> -> vector<2x128xf32>
    %13 = vector.shape_cast %12 : vector<2x128xf32> to vector<1x2x128xf32>
    %c0_9 = arith.constant 0 : index
    %c0_10 = arith.constant 0 : index
    %c0_11 = arith.constant 0 : index
    %14 = vector.load %arg5[%c0_9, %c0_10, %c0_11] : memref<1x2x128xf32, #tpu.memory_space<vmem>>, vector<1x2x128xf32>
    tpu.vector_store %arg5[%c0_9, %c0_10, %c0_11], %13 {strides = array<i32>} : memref<1x2x128xf32, #tpu.memory_space<vmem>>, vector<1x2x128xf32>,
    return
  }
  func.func @transform_0(%arg0: i32) -> (i32, i32) {
    %c0_i32 = arith.constant 0 : i32
    %c0_i32_0 = arith.constant 0 : i32
    return %arg0, %c0_i32 : i32, i32
  }
  func.func @transform_1(%arg0: i32) -> (i32, i32) {
    %c0_i32 = arith.constant 0 : i32
    %c0_i32_0 = arith.constant 0 : i32
    %c0_i32_1 = arith.constant 0 : i32
    return %c0_i32, %c0_i32_0 : i32, i32
  }
  func.func @transform_2(%arg0: i32) -> (i32, i32) {
    %c0_i32 = arith.constant 0 : i32
    %c0_i32_0 = arith.constant 0 : i32
    %c0_i32_1 = arith.constant 0 : i32
    return %c0_i32, %c0_i32_0 : i32, i32
  }
  func.func @transform_3(%arg0: i32) -> (i32, i32) {
    %c0_i32 = arith.constant 0 : i32
    %c0_i32_0 = arith.constant 0 : i32
    return %arg0, %c0_i32 : i32, i32
  }
  func.func @transform_4(%arg0: i32) -> (i32, i32, i32) {
    %c0_i32 = arith.constant 0 : i32
    %c0_i32_0 = arith.constant 0 : i32
    %c0_i32_1 = arith.constant 0 : i32
    return %arg0, %c0_i32, %c0_i32_0 : i32, i32, i32
  }
}

</mosaic_0001>

<bundles_post_ra>
// kernel: double_conv_forward.2
= control target key start
LH: loop header
LB: loop body
LE: loop exit
PB: predicated region body
PF: predicated region fallthrough
CT: control target
= control target key end

     0   :  { %s967_s15 = smov 0   ;;  %s1182_s0 = inlined_call_operand.vmem [shape: bf16[512,36], index: 0, kind: input, shape index: {}]   ;;  %s1183_s1 = inlined_call_operand.vmem [shape: bf16[36,128], index: 1, kind: input, shape index: {}]   ;;  %s1184_s2 = inlined_call_operand.vmem [shape: f32[1,128], index: 2, kind: input, shape index: {}]   ;;  %s1185_s3 = inlined_call_operand.vmem [shape: f32[512,128], index: 3, kind: output, shape index: {0}]   ;;  %s1186_s4 = inlined_call_operand.vmem [shape: f32[2,2,128], index: 4, kind: output, shape index: {1}]  }
   0x1 LB: > { %s973_s16 = sadd.s32 4294967295, %s940_s15   ;;  %p798_p0 = scmp.ge.s32.totalorder %s940_s15, 1  ;;  %s940_s15 = sphi %s967_s15, %s15_s15  }
   0x2   : > { %p166_p1 = scmp.lt.s32.totalorder %s940_s15, 3 }
   0x4   : > { %p167_p2 = pnand %p798_p0, %p166_p1 }
   0x5   : > { %v915_v0 = vld [vmem:[%s1183_s1] sm:$0xff] (!%p167_p2)   ;;  %v916_v1 = vld [vmem:[%s1183_s1 + $0x8] sm:$0xff] (!%p167_p2)   ;;  %s799_s21 = sshll.u32 (!%p167_p2), %s973_s16, 5  ;;  %v917_v2 = vld [vmem:[%s1183_s1 + $0x10] ss:$0 sps:$4 sm:$0x33] (!%p167_p2)  }
   0x6   : > { %170 = sbr.rel (%p167_p2) target bundleno = 313 (0x139), region = 32  ;;  %861 = vmatprep.subr.bf16.mxu0 (!%p167_p2), %v915_v0  ;;  %p197_p3 = scmp.lt.s32.totalorder (!%p167_p2), %s799_s21, 63  ;;  %899 = vmatprep.subr.bf16.mxu1 (!%p167_p2), %v915_v0  ;;  %vm401_vm0 = vcmask (!%p167_p2), 1041408   ;;  %vm352_vm1 = vcmask (!%p167_p2), 293888   ;;  %v1031_v20 = vld [vmem:[%s1184_s2] ss:$0 sm:$0xff] (!%p167_p2) }
   0x7   : > { %862 = vmatpush3.bf16.msra.mxu0 (!%p167_p2), %v915_v0  ;;  %902 = vmatpush3.bf16.msra.mxu1 (!%p167_p2), %v915_v0  ;;  %v403_v3 = vsel (!%p167_p2), %vm401_vm0, %v917_v2, 0  ;;  %p208_p4 = scmp.lt.s32.totalorder (!%p167_p2), %s973_s16, 1  ;;  %vm704_vm2 = vcmask (!%p167_p2), 1040384  }
   0x8   : > { %863 = vmatprep.subr.bf16.mxu0 (!%p167_p2), %v916_v1  ;;  %900 = vmatprep.subr.bf16.mxu1 (!%p167_p2), %v916_v1 }
   0xb   : > { %864 = vmatpush3.bf16.msra.mxu0 (!%p167_p2), %v916_v1  ;;  %903 = vmatpush3.bf16.msra.mxu1 (!%p167_p2), %v916_v1 }
   0xc   : > { %905 = vmatprep.subr.msk.bf16.mxu0 (!%p167_p2), %vm401_vm0, %v917_v2  ;;  %906 = vmatprep.subr.msk.bf16.mxu1 (!%p167_p2), %vm401_vm0, %v917_v2 }
   0xd   : > { %s1188_s21 = smov (!%p197_p3, %s799_s21), 63  ;;  %s1190_s16 = smov (!%p208_p4, %s973_s16), 1 }
   0xe   : > { %s800_s24 = sshll.u32 %s1188_s21, 2  ;;  %s802_s28 = sshll.u32 %s1188_s21, 3 }
   0xf   : > { %s993_s27 = scalar_lea.vmem %s1182_s0, %s800_s24  ;;  %866 = vmatpush3.bf16.msra.mxu0 %v403_v3  ;;  %904 = vmatpush3.bf16.msra.mxu1 %v403_v3  ;;  %s1036_s7 = scalar_lea.vmem %s1185_s3, %s802_s28 }
  0x10   : > { %v918_v4 = vld [vmem:[%s993_s27] sm:$0xff]   ;;  %v919_v5 = vld [vmem:[%s993_s27 + $0x8] sm:$0xff]   ;;  %v920_v6 = vld [vmem:[%s993_s27 + $0x10] sm:$0xff]   ;;  %s803_s8 = sshll.u32 %s1190_s16, 1 }
  0x11   : > { %867 = vmatprep.mubr.msk.bf16.mxu0 %vm352_vm1, %v918_v4  ;;  %v921_v7 = vld [vmem:[%s993_s27 + $0x18] sm:$0xff]   ;;  %v926_v8 = vld [vmem:[%s993_s27 + $0x40] sm:$0xff]   ;;  %v927_v9 = vld [vmem:[%s993_s27 + $0x48] sm:$0xff]   ;;  %s211_s11 = scalar_lea.vmem %s1186_s4, %s803_s8 }
  0x12   : > { %868 = vmatmul.mubr.msk.bf16.vlgmr.msra.gmra.mrb[0].mxu0 %vm352_vm1, %v919_v5  ;;  %883 = vmatprep.mubr.msk.bf16.mxu1 %vm352_vm1, %v926_v8  ;;  %v928_v10 = vld [vmem:[%s993_s27 + $0x50] sm:$0xff]   ;;  %v922_v11 = vld [vmem:[%s993_s27 + $0x20] sm:$0xff]   ;;  %v929_v12 = vld [vmem:[%s993_s27 + $0x58] sm:$0xff]  }
  0x13   : > { %871 = vmatprep.mubr.msk.bf16.mxu0 %vm352_vm1, %v920_v6  ;;  %884 = vmatmul.mubr.msk.bf16.vlgmr.msra.gmra.mrb[0].mxu1 %vm352_vm1, %v927_v9  ;;  %v930_v13 = vld [vmem:[%s993_s27 + $0x60] sm:$0xff]   ;;  %v923_v14 = vld [vmem:[%s993_s27 + $0x28] sm:$0xff]   ;;  %v924_v15 = vld [vmem:[%s993_s27 + $0x30] sm:$0xff]  }
  0x14   : > { %887 = vmatprep.mubr.msk.bf16.mxu1 %vm352_vm1, %v928_v10  ;;  %v931_v16 = vld [vmem:[%s993_s27 + $0x68] sm:$0xff]   ;;  %v932_v17 = vld [vmem:[%s993_s27 + $0x70] sm:$0xff]   ;;  %v925_v18 = vld [vmem:[%s993_s27 + $0x38] sm:$0xff]  }
  0x15   : > { %v933_v19 = vld [vmem:[%s993_s27 + $0x78] sm:$0xff]  }
  0x1a   : > { %872 = vmatmul.mubr.msk.bf16.gmra.mrb[4].mxu0 %vm352_vm1, %v921_v7 }
  0x1b   : > { %875 = vmatprep.mubr.msk.bf16.mxu0 %vm352_vm1, %v922_v11  ;;  %888 = vmatmul.mubr.msk.bf16.gmra.mrb[4].mxu1 %vm352_vm1, %v929_v12 }
  0x1c   : > { %891 = vmatprep.mubr.msk.bf16.mxu1 %vm352_vm1, %v930_v13 }
  0x22   : > { %876 = vmatmul.mubr.msk.bf16.gmra.mrb[8].mxu0 %vm352_vm1, %v923_v14 }
  0x23   : > { %879 = vmatprep.mubr.msk.bf16.mxu0 %vm352_vm1, %v924_v15  ;;  %892 = vmatmul.mubr.msk.bf16.gmra.mrb[8].mxu1 %vm352_vm1, %v931_v16 }
  0x24   : > { %895 = vmatprep.mubr.msk.bf16.mxu1 %vm352_vm1, %v932_v17 }
  0x2a   : > { %880 = vmatmul.mubr.msk.bf16.gmra.mrb[12].mxu0 %vm352_vm1, %v925_v18 }
  0x2b   : > { %896 = vmatmul.mubr.msk.bf16.gmra.mrb[12].mxu1 %vm352_vm1, %v933_v19 }
  0xe5   : > { %v869_v21 = vpop.f32.mrb[0].mxu0 }
  0xe6   : > { %v448_v22 = vadd.f32 %v869_v21, %v1031_v20  ;;  %v439_v23 = vpop.f32.mrb[1].mxu0  ;;  %v885_v29 = vpop.f32.mrb[0].mxu1 }
  0xe7   : > { %v440_v24 = vadd.f32 %v1031_v20, %v439_v23  ;;  %v870_v25 = vpop.f32.mrb[2].mxu0  ;;  %v1047_v33 = vadd.f32 %v885_v29, %v1031_v20  ;;  %v503_v34 = vpop.f32.mrb[1].mxu1 }
  0xe8   : > { %568 = vst [vmem:[%s1036_s7 + $0x10] sm:$0xff] %v448_v22  ;;  %v451_v26 = vadd.f32 %v870_v25, %v1031_v20  ;;  %v442_v27 = vpop.f32.mrb[3].mxu0  ;;  %v1050_v35 = vadd.f32 %v1031_v20, %v503_v34  ;;  %v886_v36 = vpop.f32.mrb[2].mxu1  ;;  %v637_v37 = vmul.f32 %v448_v22, %v448_v22 }
  0xe9   : > { %566 = vst [vmem:[%s1036_s7] sm:$0xff] %v440_v24  ;;  %v443_v28 = vadd.f32 %v1031_v20, %v442_v27  ;;  %v635_v30 = vmul.f32 %v440_v24, %v440_v24  ;;  %584 = vst [vmem:[%s1036_s7 + $0x90] sm:$0xff] %v1047_v33  ;;  %v1055_v41 = vadd.f32 %v886_v36, %v1031_v20  ;;  %v506_v42 = vpop.f32.mrb[3].mxu1 }
  0xea   : > { %569 = vst [vmem:[%s1036_s7 + $0x18] sm:$0xff] %v451_v26  ;;  %582 = vst [vmem:[%s1036_s7 + $0x80] sm:$0xff] %v1050_v35  ;;  %v1061_v45 = vadd.f32 %v1031_v20, %v506_v42  ;;  %v638_v46 = vmul.f32 %v451_v26, %v451_v26 }
  0xeb   : > { %567 = vst [vmem:[%s1036_s7 + $0x8] sm:$0xff] %v443_v28  ;;  %v598_v31 = vadd.f32 %v443_v28, %v440_v24  ;;  %v636_v32 = vmul.f32 %v443_v28, %v443_v28  ;;  %585 = vst [vmem:[%s1036_s7 + $0x98] sm:$0xff] %v1055_v41 }
  0xec   : > { %583 = vst [vmem:[%s1036_s7 + $0x88] sm:$0xff] %v1061_v45 }
  0xed   : > { %v599_v38 = vadd.f32 %v598_v31, %v448_v22  ;;  %v667_v39 = vadd.f32 %v636_v32, %v635_v30  ;;  %v873_v40 = vpop.f32.mrb[4].mxu0 }
  0xee   : > { %v464_v43 = vadd.f32 %v873_v40, %v1031_v20  ;;  %v455_v44 = vpop.f32.mrb[5].mxu0  ;;  %v889_v57 = vpop.f32.mrb[4].mxu1 }
  0xef   : > { %v668_v47 = vadd.f32 %v667_v39, %v637_v37  ;;  %v456_v48 = vadd.f32 %v1031_v20, %v455_v44  ;;  %v600_v49 = vadd.f32 %v599_v38, %v451_v26  ;;  %v874_v50 = vpop.f32.mrb[6].mxu0  ;;  %v1075_v61 = vadd.f32 %v889_v57, %v1031_v20  ;;  %v519_v62 = vpop.f32.mrb[5].mxu1 }
  0xf0   : > { %572 = vst [vmem:[%s1036_s7 + $0x30] sm:$0xff] %v464_v43  ;;  %v467_v51 = vadd.f32 %v874_v50, %v1031_v20  ;;  %v458_v52 = vpop.f32.mrb[7].mxu0  ;;  %v1078_v63 = vadd.f32 %v1031_v20, %v519_v62  ;;  %v890_v0 = vpop.f32.mrb[6].mxu1  ;;  %v641_v1 = vmul.f32 %v464_v43, %v464_v43 }
  0xf1   : > { %570 = vst [vmem:[%s1036_s7 + $0x20] sm:$0xff] %v456_v48  ;;  %v601_v53 = vadd.f32 %v600_v49, %v456_v48  ;;  %v639_v54 = vmul.f32 %v456_v48, %v456_v48  ;;  %v669_v55 = vadd.f32 %v668_v47, %v638_v46  ;;  %v459_v56 = vadd.f32 %v1031_v20, %v458_v52  ;;  %v522_v6 = vpop.f32.mrb[7].mxu1 }
  0xf2   : > { %573 = vst [vmem:[%s1036_s7 + $0x38] sm:$0xff] %v467_v51  ;;  %588 = vst [vmem:[%s1036_s7 + $0xb0] sm:$0xff] %v1075_v61  ;;  %v1083_v5 = vadd.f32 %v890_v0, %v1031_v20  ;;  %v1089_v9 = vadd.f32 %v1031_v20, %v522_v6  ;;  %v642_v10 = vmul.f32 %v467_v51, %v467_v51 }
  0xf3   : > { %v670_v58 = vadd.f32 %v669_v55, %v639_v54  ;;  %571 = vst [vmem:[%s1036_s7 + $0x28] sm:$0xff] %v459_v56  ;;  %v602_v59 = vadd.f32 %v601_v53, %v459_v56  ;;  %v640_v60 = vmul.f32 %v459_v56, %v459_v56  ;;  %586 = vst [vmem:[%s1036_s7 + $0xa0] sm:$0xff] %v1078_v63 }
  0xf4   : > { %589 = vst [vmem:[%s1036_s7 + $0xb8] sm:$0xff] %v1083_v5  ;;  %587 = vst [vmem:[%s1036_s7 + $0xa8] sm:$0xff] %v1089_v9 }
  0xf5   : > { %v603_v2 = vadd.f32 %v602_v59, %v464_v43  ;;  %v671_v3 = vadd.f32 %v670_v58, %v640_v60  ;;  %v877_v4 = vpop.f32.mrb[8].mxu0 }
  0xf6   : > { %v480_v7 = vadd.f32 %v877_v4, %v1031_v20  ;;  %v471_v8 = vpop.f32.mrb[9].mxu0  ;;  %v893_v22 = vpop.f32.mrb[8].mxu1 }
  0xf7   : > { %v672_v11 = vadd.f32 %v671_v3, %v641_v1  ;;  %v472_v12 = vadd.f32 %v1031_v20, %v471_v8  ;;  %v604_v13 = vadd.f32 %v603_v2, %v467_v51  ;;  %v878_v14 = vpop.f32.mrb[10].mxu0  ;;  %v1103_v26 = vadd.f32 %v893_v22, %v1031_v20  ;;  %v535_v27 = vpop.f32.mrb[9].mxu1 }
  0xf8   : > { %576 = vst [vmem:[%s1036_s7 + $0x50] sm:$0xff] %v480_v7  ;;  %v483_v15 = vadd.f32 %v878_v14, %v1031_v20  ;;  %v474_v16 = vpop.f32.mrb[11].mxu0  ;;  %v1106_v28 = vadd.f32 %v1031_v20, %v535_v27  ;;  %v894_v29 = vpop.f32.mrb[10].mxu1  ;;  %v645_v30 = vmul.f32 %v480_v7, %v480_v7  ;;  %v656_v27 = vmul.f32 %v1089_v9, %v1089_v9 }
  0xf9   : > { %574 = vst [vmem:[%s1036_s7 + $0x40] sm:$0xff] %v472_v12  ;;  %v605_v17 = vadd.f32 %v604_v13, %v472_v12  ;;  %v643_v18 = vmul.f32 %v472_v12, %v472_v12  ;;  %v673_v19 = vadd.f32 %v672_v11, %v642_v10  ;;  %v475_v21 = vadd.f32 %v1031_v20, %v474_v16  ;;  %v538_v37 = vpop.f32.mrb[11].mxu1 }
  0xfa   : > { %577 = vst [vmem:[%s1036_s7 + $0x58] sm:$0xff] %v483_v15  ;;  %592 = vst [vmem:[%s1036_s7 + $0xd0] sm:$0xff] %v1103_v26  ;;  %v1111_v36 = vadd.f32 %v894_v29, %v1031_v20  ;;  %v1117_v40 = vadd.f32 %v1031_v20, %v538_v37  ;;  %v646_v42 = vmul.f32 %v483_v15, %v483_v15 }
  0xfb   : > { %v674_v23 = vadd.f32 %v673_v19, %v643_v18  ;;  %575 = vst [vmem:[%s1036_s7 + $0x48] sm:$0xff] %v475_v21  ;;  %v606_v24 = vadd.f32 %v605_v17, %v475_v21  ;;  %v644_v25 = vmul.f32 %v475_v21, %v475_v21  ;;  %590 = vst [vmem:[%s1036_s7 + $0xc0] sm:$0xff] %v1106_v28 }
  0xfc   : > { %593 = vst [vmem:[%s1036_s7 + $0xd8] sm:$0xff] %v1111_v36  ;;  %591 = vst [vmem:[%s1036_s7 + $0xc8] sm:$0xff] %v1117_v40  ;;  %v651_v11 = vmul.f32 %v1050_v35, %v1050_v35  ;;  %v652_v16 = vmul.f32 %v1061_v45, %v1061_v45  ;;  %v654_v19 = vmul.f32 %v1055_v41, %v1055_v41 }
  0xfd   : > { %v607_v31 = vadd.f32 %v606_v24, %v480_v7  ;;  %v675_v32 = vadd.f32 %v674_v23, %v644_v25  ;;  %v881_v34 = vpop.f32.mrb[12].mxu0 }
  0xfe   : > { %v496_v38 = vadd.f32 %v881_v34, %v1031_v20  ;;  %v487_v39 = vpop.f32.mrb[13].mxu0  ;;  %v897_v54 = vpop.f32.mrb[12].mxu1 }
  0xff   : > { %v676_v43 = vadd.f32 %v675_v32, %v645_v30  ;;  %v488_v44 = vadd.f32 %v1031_v20, %v487_v39  ;;  %v608_v46 = vadd.f32 %v607_v31, %v483_v15  ;;  %v882_v47 = vpop.f32.mrb[14].mxu0  ;;  %v560_v58 = vadd.f32 %v897_v54, %v1031_v20  ;;  %v551_v59 = vpop.f32.mrb[13].mxu1 }
 0x100   : > { %580 = vst [vmem:[%s1036_s7 + $0x70] sm:$0xff] %v496_v38  ;;  %v499_v48 = vadd.f32 %v882_v47, %v1031_v20  ;;  %v490_v49 = vpop.f32.mrb[15].mxu0  ;;  %v552_v60 = vadd.f32 %v1031_v20, %v551_v59  ;;  %v898_v62 = vpop.f32.mrb[14].mxu1  ;;  %v649_v0 = vmul.f32 %v496_v38, %v496_v38  ;;  %v660_v39 = vmul.f32 %v1117_v40, %v1117_v40 }
 0x101   : > { %578 = vst [vmem:[%s1036_s7 + $0x60] sm:$0xff] %v488_v44  ;;  %v609_v50 = vadd.f32 %v608_v46, %v488_v44  ;;  %v647_v51 = vmul.f32 %v488_v44, %v488_v44  ;;  %v677_v52 = vadd.f32 %v676_v43, %v646_v42  ;;  %v491_v53 = vadd.f32 %v1031_v20, %v490_v49  ;;  %v554_v4 = vpop.f32.mrb[15].mxu1 }
 0x102   : > { %581 = vst [vmem:[%s1036_s7 + $0x78] sm:$0xff] %v499_v48  ;;  %596 = vst [vmem:[%s1036_s7 + $0xf0] sm:$0xff] %v560_v58  ;;  %v563_v3 = vadd.f32 %v898_v62, %v1031_v20  ;;  %v555_v6 = vadd.f32 %v1031_v20, %v554_v4  ;;  %v650_v7 = vmul.f32 %v499_v48, %v499_v48 }
 0x103   : > { %v678_v55 = vadd.f32 %v677_v52, %v647_v51  ;;  %579 = vst [vmem:[%s1036_s7 + $0x68] sm:$0xff] %v491_v53  ;;  %v610_v56 = vadd.f32 %v609_v50, %v491_v53  ;;  %v648_v57 = vmul.f32 %v491_v53, %v491_v53  ;;  %594 = vst [vmem:[%s1036_s7 + $0xe0] sm:$0xff] %v552_v60 }
 0x104   : > { %597 = vst [vmem:[%s1036_s7 + $0xf8] sm:$0xff] %v563_v3  ;;  %595 = vst [vmem:[%s1036_s7 + $0xe8] sm:$0xff] %v555_v6  ;;  %v653_v20 = vmul.f32 %v1047_v33, %v1047_v33  ;;  %v663_v46 = vmul.f32 %v552_v60, %v552_v60  ;;  %v665_v51 = vmul.f32 %v560_v58, %v560_v58 }
 0x105   : > { %v611_v1 = vadd.f32 %v610_v56, %v496_v38  ;;  %v679_v2 = vadd.f32 %v678_v55, %v648_v57  ;;  %v666_v54 = vmul.f32 %v563_v3, %v563_v3 }
 0x107   : > { %v680_v8 = vadd.f32 %v679_v2, %v649_v0  ;;  %v612_v10 = vadd.f32 %v611_v1, %v499_v48 }
 0x109   : > { %v613_v12 = vadd.f32 %v612_v10, %v1050_v35  ;;  %v681_v13 = vadd.f32 %v680_v8, %v650_v7  ;;  %v655_v35 = vmul.f32 %v1078_v63, %v1078_v63 }
 0x10b   : > { %v682_v14 = vadd.f32 %v681_v13, %v651_v11  ;;  %v614_v15 = vadd.f32 %v613_v12, %v1061_v45 }
 0x10d   : > { %v615_v17 = vadd.f32 %v614_v15, %v1047_v33  ;;  %v683_v18 = vadd.f32 %v682_v14, %v652_v16  ;;  %v657_v33 = vmul.f32 %v1075_v61, %v1075_v61 }
 0x10f   : > { %v684_v21 = vadd.f32 %v683_v18, %v653_v20  ;;  %v616_v22 = vadd.f32 %v615_v17, %v1055_v41  ;;  %v658_v41 = vmul.f32 %v1083_v5, %v1083_v5 }
 0x111   : > { %v617_v23 = vadd.f32 %v616_v22, %v1078_v63  ;;  %v685_v24 = vadd.f32 %v684_v21, %v654_v19  ;;  %v659_v63 = vmul.f32 %v1106_v28, %v1106_v28 }
 0x113   : > { %v686_v25 = vadd.f32 %v685_v24, %v655_v35  ;;  %v618_v45 = vadd.f32 %v617_v23, %v1089_v9 }
 0x115   : > { %v619_v29 = vadd.f32 %v618_v45, %v1075_v61  ;;  %v687_v30 = vadd.f32 %v686_v25, %v656_v27  ;;  %v661_v61 = vmul.f32 %v1103_v26, %v1103_v26 }
 0x117   : > { %v688_v31 = vadd.f32 %v687_v30, %v657_v33  ;;  %v620_v32 = vadd.f32 %v619_v29, %v1083_v5  ;;  %v662_v5 = vmul.f32 %v1111_v36, %v1111_v36 }
 0x119   : > { %v621_v34 = vadd.f32 %v620_v32, %v1106_v28  ;;  %v689_v37 = vadd.f32 %v688_v31, %v658_v41 }
 0x11b   : > { %v690_v38 = vadd.f32 %v689_v37, %v659_v63  ;;  %v622_v9 = vadd.f32 %v621_v34, %v1117_v40  ;;  %v664_v40 = vmul.f32 %v555_v6, %v555_v6 }
 0x11d   : > { %v623_v42 = vadd.f32 %v622_v9, %v1103_v26  ;;  %v691_v43 = vadd.f32 %v690_v38, %v660_v39 }
 0x11f   : > { %v692_v44 = vadd.f32 %v691_v43, %v661_v61  ;;  %v624_v28 = vadd.f32 %v623_v42, %v1111_v36 }
 0x121   : > { %v625_v47 = vadd.f32 %v624_v28, %v552_v60  ;;  %v693_v48 = vadd.f32 %v692_v44, %v662_v5 }
 0x123   : > { %v694_v49 = vadd.f32 %v693_v48, %v663_v46  ;;  %v626_v50 = vadd.f32 %v625_v47, %v555_v6 }
 0x125   : > { %v627_v52 = vadd.f32 %v626_v50, %v560_v58  ;;  %v695_v53 = vadd.f32 %v694_v49, %v664_v40 }
 0x127   : > { %v628_v26 = vadd.f32 %v627_v52, %v563_v3  ;;  %v696_v55 = vadd.f32 %v695_v53, %v665_v51 }
 0x129   : > { %v629_v56 = vrot.slane %v628_v26, 4  ;;  %v697_v57 = vadd.f32 %v696_v55, %v666_v54 }
 0x12b   : > { %v630_v59 = vadd.f32 %v629_v56, %v628_v26  ;;  %v698_v62 = vrot.slane %v697_v57, 4 }
 0x12d   : > { %v631_v0 = vrot.slane %v630_v59, 2  ;;  %v699_v36 = vadd.f32 %v698_v62, %v697_v57 }
 0x12f   : > { %v632_v60 = vadd.f32 %v631_v0, %v630_v59  ;;  %v700_v1 = vrot.slane %v699_v36, 2 }
 0x131   : > { %v633_v2 = vrot.slane %v632_v60, 1  ;;  %v701_v4 = vadd.f32 %v700_v1, %v699_v36 }
 0x133   : > { %v702_v6 = vrot.slane %v701_v4, 1  ;;  %v634_v58 = vadd.f32 %v633_v2, %v632_v60 }
 0x135   : > { %v703_v3 = vadd.f32 %v702_v6, %v701_v4 }
 0x137   : > { %v705_v7 = vsel %vm704_vm2, %v634_v58, %v703_v3 }
 0x138   : > { %706 = vst [vmem:[%s211_s11] sm:$0x3] %v705_v7 }
 0x139 PF: > { %s15_s15 = sadd.s32 1, %s940_s15  }
 0x13a   : > { %p12_p5 = scmp.ge.s32.totalorder %s15_s15, 4  }
 0x13c   :  { %14 = sbr.rel (!%p12_p5) target bundleno = 1 (0x1), region = 74 }

// kernel: double_conv_forward.3
= control target key start
LH: loop header
LB: loop body
LE: loop exit
PB: predicated region body
PF: predicated region fallthrough
CT: control target
= control target key end

     0   :  { %s997_s15 = smov 0   ;;  %s1236_s0 = inlined_call_operand.vmem [shape: bf16[512,72], index: 0, kind: input, shape index: {}]   ;;  %s1237_s1 = inlined_call_operand.vmem [shape: bf16[72,128], index: 1, kind: input, shape index: {}]   ;;  %s1238_s2 = inlined_call_operand.vmem [shape: f32[1,128], index: 2, kind: input, shape index: {}]   ;;  %s1239_s3 = inlined_call_operand.vmem [shape: f32[512,128], index: 3, kind: output, shape index: {0}]   ;;  %s1240_s4 = inlined_call_operand.vmem [shape: f32[2,2,128], index: 4, kind: output, shape index: {1}]  }
   0x1 LB: > { %s1003_s16 = sadd.s32 4294967295, %s970_s15   ;;  %p814_p0 = scmp.ge.s32.totalorder %s970_s15, 1  ;;  %s970_s15 = sphi %s997_s15, %s15_s15  }
   0x2   : > { %p166_p1 = scmp.lt.s32.totalorder %s970_s15, 3 }
   0x4   : > { %p167_p2 = pnand %p814_p0, %p166_p1 }
   0x5   : > { %v943_v0 = vld [vmem:[%s1237_s1] sm:$0xff] (!%p167_p2)   ;;  %v944_v1 = vld [vmem:[%s1237_s1 + $0x8] sm:$0xff] (!%p167_p2)   ;;  %s815_s21 = sshll.u32 (!%p167_p2), %s1003_s16, 5  ;;  %v945_v2 = vld [vmem:[%s1237_s1 + $0x10] sm:$0xff] (!%p167_p2)   ;;  %vm368_vm0 = vcmask (!%p167_p2), 588800   ;;  %vm417_vm1 = vcmask (!%p167_p2), 1043456  }
   0x6   : > { %170 = sbr.rel (%p167_p2) target bundleno = 321 (0x141), region = 32  ;;  %881 = vmatprep.subr.bf16.mxu0 (!%p167_p2), %v943_v0  ;;  %p197_p3 = scmp.lt.s32.totalorder (!%p167_p2), %s815_s21, 63  ;;  %923 = vmatprep.subr.bf16.mxu1 (!%p167_p2), %v943_v0  ;;  %v946_v3 = vld [vmem:[%s1237_s1 + $0x18] sm:$0xff] (!%p167_p2)   ;;  %v947_v5 = vld [vmem:[%s1237_s1 + $0x20] ss:$0 sps:$4 sm:$0xff] (!%p167_p2)   ;;  %vm720_vm2 = vcmask (!%p167_p2), 1040384  }
   0x7   : > { %882 = vmatpush3.bf16.msra.mxu0 (!%p167_p2), %v943_v0  ;;  %928 = vmatpush3.bf16.msra.mxu1 (!%p167_p2), %v943_v0  ;;  %v419_v6 = vsel (!%p167_p2), %vm417_vm1, %v947_v5, 0  ;;  %v1067_v22 = vld [vmem:[%s1238_s2] ss:$0 sm:$0xff] (!%p167_p2)  ;;  %p208_p4 = scmp.lt.s32.totalorder (!%p167_p2), %s1003_s16, 1 }
   0x8   : > { %883 = vmatprep.subr.bf16.mxu0 (!%p167_p2), %v944_v1  ;;  %924 = vmatprep.subr.bf16.mxu1 (!%p167_p2), %v944_v1 }
   0xb   : > { %884 = vmatpush3.bf16.msra.mxu0 (!%p167_p2), %v944_v1  ;;  %929 = vmatpush3.bf16.msra.mxu1 (!%p167_p2), %v944_v1 }
   0xc   : > { %885 = vmatprep.subr.bf16.mxu0 (!%p167_p2), %v945_v2  ;;  %925 = vmatprep.subr.bf16.mxu1 (!%p167_p2), %v945_v2 }
   0xd   : > { %s1242_s21 = smov (!%p197_p3, %s815_s21), 63  ;;  %s1244_s16 = smov (!%p208_p4, %s1003_s16), 1 }
   0xe   : > { %s816_s24 = sshll.u32 %s1242_s21, 2  ;;  %s818_s6 = sshll.u32 %s1242_s21, 3 }
   0xf   : > { %s1026_s29 = scalar_lea.vmem %s1236_s0, %s816_s24  ;;  %886 = vmatpush3.bf16.msra.mxu0 %v945_v2  ;;  %930 = vmatpush3.bf16.msra.mxu1 %v945_v2  ;;  %s1072_s11 = scalar_lea.vmem %s1239_s3, %s818_s6 }
  0x10   : > { %v948_v4 = vld [vmem:[%s1026_s29] sm:$0xff]   ;;  %887 = vmatprep.subr.bf16.mxu0 %v946_v3  ;;  %926 = vmatprep.subr.bf16.mxu1 %v946_v3  ;;  %v949_v7 = vld [vmem:[%s1026_s29 + $0x8] sm:$0xff]   ;;  %v950_v9 = vld [vmem:[%s1026_s29 + $0x10] sm:$0xff]   ;;  %s819_s12 = sshll.u32 %s1244_s16, 1 }
  0x11   : > { %891 = vmatprep.mubr.msk.bf16.mxu0 %vm368_vm0, %v948_v4  ;;  %v956_v8 = vld [vmem:[%s1026_s29 + $0x40] sm:$0xff]   ;;  %v957_v10 = vld [vmem:[%s1026_s29 + $0x48] sm:$0xff]   ;;  %v958_v11 = vld [vmem:[%s1026_s29 + $0x50] sm:$0xff]   ;;  %s211_s17 = scalar_lea.vmem %s1240_s4, %s819_s12 }
  0x12   : > { %907 = vmatprep.mubr.msk.bf16.mxu1 %vm368_vm0, %v956_v8  ;;  %v951_v12 = vld [vmem:[%s1026_s29 + $0x18] sm:$0xff]   ;;  %v952_v14 = vld [vmem:[%s1026_s29 + $0x20] sm:$0xff]   ;;  %v953_v16 = vld [vmem:[%s1026_s29 + $0x28] sm:$0xff]  }
  0x13   : > { %888 = vmatpush3.bf16.msra.mxu0 %v946_v3  ;;  %931 = vmatpush3.bf16.msra.mxu1 %v946_v3  ;;  %v959_v13 = vld [vmem:[%s1026_s29 + $0x58] sm:$0xff]   ;;  %v960_v15 = vld [vmem:[%s1026_s29 + $0x60] sm:$0xff]   ;;  %v961_v17 = vld [vmem:[%s1026_s29 + $0x68] sm:$0xff]  }
  0x14   : > { %933 = vmatprep.subr.msk.bf16.mxu0 %vm417_vm1, %v947_v5  ;;  %934 = vmatprep.subr.msk.bf16.mxu1 %vm417_vm1, %v947_v5  ;;  %v954_v18 = vld [vmem:[%s1026_s29 + $0x30] sm:$0xff]   ;;  %v955_v20 = vld [vmem:[%s1026_s29 + $0x38] sm:$0xff]  }
  0x15   : > { %v962_v19 = vld [vmem:[%s1026_s29 + $0x70] sm:$0xff]   ;;  %v963_v21 = vld [vmem:[%s1026_s29 + $0x78] sm:$0xff]  }
  0x17   : > { %890 = vmatpush3.bf16.msra.mxu0 %v419_v6  ;;  %932 = vmatpush3.bf16.msra.mxu1 %v419_v6 }
  0x1a   : > { %892 = vmatmul.mubr.msk.bf16.vlgmr.msra.gmra.mrb[0].mxu0 %vm368_vm0, %v949_v7  ;;  %908 = vmatmul.mubr.msk.bf16.vlgmr.msra.gmra.mrb[0].mxu1 %vm368_vm0, %v957_v10 }
  0x1b   : > { %895 = vmatprep.mubr.msk.bf16.mxu0 %vm368_vm0, %v950_v9  ;;  %911 = vmatprep.mubr.msk.bf16.mxu1 %vm368_vm0, %v958_v11 }
  0x22   : > { %896 = vmatmul.mubr.msk.bf16.gmra.mrb[4].mxu0 %vm368_vm0, %v951_v12  ;;  %912 = vmatmul.mubr.msk.bf16.gmra.mrb[4].mxu1 %vm368_vm0, %v959_v13 }
  0x23   : > { %899 = vmatprep.mubr.msk.bf16.mxu0 %vm368_vm0, %v952_v14  ;;  %915 = vmatprep.mubr.msk.bf16.mxu1 %vm368_vm0, %v960_v15 }
  0x2a   : > { %900 = vmatmul.mubr.msk.bf16.gmra.mrb[8].mxu0 %vm368_vm0, %v953_v16  ;;  %916 = vmatmul.mubr.msk.bf16.gmra.mrb[8].mxu1 %vm368_vm0, %v961_v17 }
  0x2b   : > { %903 = vmatprep.mubr.msk.bf16.mxu0 %vm368_vm0, %v954_v18  ;;  %919 = vmatprep.mubr.msk.bf16.mxu1 %vm368_vm0, %v962_v19 }
  0x32   : > { %904 = vmatmul.mubr.msk.bf16.gmra.mrb[12].mxu0 %vm368_vm0, %v955_v20  ;;  %920 = vmatmul.mubr.msk.bf16.gmra.mrb[12].mxu1 %vm368_vm0, %v963_v21 }
  0xed   : > { %v893_v23 = vpop.f32.mrb[0].mxu0  ;;  %v909_v24 = vpop.f32.mrb[0].mxu1 }
  0xee   : > { %v464_v25 = vadd.f32 %v893_v23, %v1067_v22  ;;  %v455_v26 = vpop.f32.mrb[1].mxu0  ;;  %v1076_v27 = vadd.f32 %v909_v24, %v1067_v22  ;;  %v519_v28 = vpop.f32.mrb[1].mxu1 }
  0xef   : > { %v456_v29 = vadd.f32 %v1067_v22, %v455_v26  ;;  %v894_v30 = vpop.f32.mrb[2].mxu0  ;;  %v1080_v31 = vadd.f32 %v1067_v22, %v519_v28  ;;  %v910_v32 = vpop.f32.mrb[2].mxu1 }
  0xf0   : > { %584 = vst [vmem:[%s1072_s11 + $0x10] sm:$0xff] %v464_v25  ;;  %v467_v33 = vadd.f32 %v894_v30, %v1067_v22  ;;  %v458_v34 = vpop.f32.mrb[3].mxu0  ;;  %600 = vst [vmem:[%s1072_s11 + $0x90] sm:$0xff] %v1076_v27  ;;  %v1087_v35 = vadd.f32 %v910_v32, %v1067_v22  ;;  %v522_v36 = vpop.f32.mrb[3].mxu1  ;;  %v653_v42 = vmul.f32 %v464_v25, %v464_v25 }
  0xf1   : > { %582 = vst [vmem:[%s1072_s11] sm:$0xff] %v456_v29  ;;  %v459_v37 = vadd.f32 %v1067_v22, %v458_v34  ;;  %598 = vst [vmem:[%s1072_s11 + $0x80] sm:$0xff] %v1080_v31  ;;  %v1094_v38 = vadd.f32 %v1067_v22, %v522_v36  ;;  %v651_v39 = vmul.f32 %v456_v29, %v456_v29 }
  0xf2   : > { %585 = vst [vmem:[%s1072_s11 + $0x18] sm:$0xff] %v467_v33  ;;  %601 = vst [vmem:[%s1072_s11 + $0x98] sm:$0xff] %v1087_v35  ;;  %v654_v47 = vmul.f32 %v467_v33, %v467_v33 }
  0xf3   : > { %583 = vst [vmem:[%s1072_s11 + $0x8] sm:$0xff] %v459_v37  ;;  %v614_v40 = vadd.f32 %v459_v37, %v456_v29  ;;  %v652_v41 = vmul.f32 %v459_v37, %v459_v37  ;;  %599 = vst [vmem:[%s1072_s11 + $0x88] sm:$0xff] %v1094_v38 }
  0xf5   : > { %v615_v43 = vadd.f32 %v614_v40, %v464_v25  ;;  %v683_v44 = vadd.f32 %v652_v41, %v651_v39  ;;  %v897_v45 = vpop.f32.mrb[4].mxu0  ;;  %v913_v46 = vpop.f32.mrb[4].mxu1 }
  0xf6   : > { %v480_v48 = vadd.f32 %v897_v45, %v1067_v22  ;;  %v471_v49 = vpop.f32.mrb[5].mxu0  ;;  %v1104_v50 = vadd.f32 %v913_v46, %v1067_v22  ;;  %v535_v51 = vpop.f32.mrb[5].mxu1 }
  0xf7   : > { %v684_v52 = vadd.f32 %v683_v44, %v653_v42  ;;  %v472_v53 = vadd.f32 %v1067_v22, %v471_v49  ;;  %v616_v54 = vadd.f32 %v615_v43, %v467_v33  ;;  %v898_v55 = vpop.f32.mrb[6].mxu0  ;;  %v1108_v56 = vadd.f32 %v1067_v22, %v535_v51  ;;  %v914_v57 = vpop.f32.mrb[6].mxu1 }
  0xf8   : > { %588 = vst [vmem:[%s1072_s11 + $0x30] sm:$0xff] %v480_v48  ;;  %v483_v58 = vadd.f32 %v898_v55, %v1067_v22  ;;  %v474_v59 = vpop.f32.mrb[7].mxu0  ;;  %604 = vst [vmem:[%s1072_s11 + $0xb0] sm:$0xff] %v1104_v50  ;;  %v1115_v60 = vadd.f32 %v914_v57, %v1067_v22  ;;  %v538_v61 = vpop.f32.mrb[7].mxu1  ;;  %v657_v6 = vmul.f32 %v480_v48, %v480_v48 }
  0xf9   : > { %586 = vst [vmem:[%s1072_s11 + $0x20] sm:$0xff] %v472_v53  ;;  %v617_v62 = vadd.f32 %v616_v54, %v472_v53  ;;  %v655_v63 = vmul.f32 %v472_v53, %v472_v53  ;;  %v685_v0 = vadd.f32 %v684_v52, %v654_v47  ;;  %v475_v1 = vadd.f32 %v1067_v22, %v474_v59 }
  0xfa   : > { %602 = vst [vmem:[%s1072_s11 + $0xa0] sm:$0xff] %v1108_v56  ;;  %589 = vst [vmem:[%s1072_s11 + $0x38] sm:$0xff] %v483_v58  ;;  %v1125_v2 = vadd.f32 %v1067_v22, %v538_v61  ;;  %v658_v11 = vmul.f32 %v483_v58, %v483_v58 }
  0xfb   : > { %605 = vst [vmem:[%s1072_s11 + $0xb8] sm:$0xff] %v1115_v60  ;;  %v686_v3 = vadd.f32 %v685_v0, %v655_v63  ;;  %587 = vst [vmem:[%s1072_s11 + $0x28] sm:$0xff] %v475_v1  ;;  %v618_v4 = vadd.f32 %v617_v62, %v475_v1  ;;  %v656_v5 = vmul.f32 %v475_v1, %v475_v1 }
  0xfc   : > { %603 = vst [vmem:[%s1072_s11 + $0xa8] sm:$0xff] %v1125_v2 }
  0xfd   : > { %v619_v7 = vadd.f32 %v618_v4, %v480_v48  ;;  %v687_v8 = vadd.f32 %v686_v3, %v656_v5  ;;  %v901_v9 = vpop.f32.mrb[8].mxu0  ;;  %v917_v10 = vpop.f32.mrb[8].mxu1 }
  0xfe   : > { %v496_v12 = vadd.f32 %v901_v9, %v1067_v22  ;;  %v487_v13 = vpop.f32.mrb[9].mxu0  ;;  %v1132_v14 = vadd.f32 %v917_v10, %v1067_v22  ;;  %v551_v15 = vpop.f32.mrb[9].mxu1 }
  0xff   : > { %v688_v16 = vadd.f32 %v687_v8, %v657_v6  ;;  %v488_v17 = vadd.f32 %v1067_v22, %v487_v13  ;;  %v620_v18 = vadd.f32 %v619_v7, %v483_v58  ;;  %v902_v19 = vpop.f32.mrb[10].mxu0  ;;  %v1136_v20 = vadd.f32 %v1067_v22, %v551_v15  ;;  %v918_v21 = vpop.f32.mrb[10].mxu1 }
 0x100   : > { %592 = vst [vmem:[%s1072_s11 + $0x50] sm:$0xff] %v496_v12  ;;  %v499_v23 = vadd.f32 %v902_v19, %v1067_v22  ;;  %v490_v24 = vpop.f32.mrb[11].mxu0  ;;  %608 = vst [vmem:[%s1072_s11 + $0xd0] sm:$0xff] %v1132_v14  ;;  %v1143_v25 = vadd.f32 %v918_v21, %v1067_v22  ;;  %v554_v26 = vpop.f32.mrb[11].mxu1  ;;  %v661_v39 = vmul.f32 %v496_v12, %v496_v12 }
 0x101   : > { %590 = vst [vmem:[%s1072_s11 + $0x40] sm:$0xff] %v488_v17  ;;  %v621_v28 = vadd.f32 %v620_v18, %v488_v17  ;;  %v659_v29 = vmul.f32 %v488_v17, %v488_v17  ;;  %v689_v30 = vadd.f32 %v688_v16, %v658_v11  ;;  %v491_v32 = vadd.f32 %v1067_v22, %v490_v24 }
 0x102   : > { %606 = vst [vmem:[%s1072_s11 + $0xc0] sm:$0xff] %v1136_v20  ;;  %593 = vst [vmem:[%s1072_s11 + $0x58] sm:$0xff] %v499_v23  ;;  %v1153_v33 = vadd.f32 %v1067_v22, %v554_v26  ;;  %v662_v44 = vmul.f32 %v499_v23, %v499_v23  ;;  %v667_v13 = vmul.f32 %v1080_v31, %v1080_v31 }
 0x103   : > { %609 = vst [vmem:[%s1072_s11 + $0xd8] sm:$0xff] %v1143_v25  ;;  %v690_v34 = vadd.f32 %v689_v30, %v659_v29  ;;  %591 = vst [vmem:[%s1072_s11 + $0x48] sm:$0xff] %v491_v32  ;;  %v622_v36 = vadd.f32 %v621_v28, %v491_v32  ;;  %v660_v37 = vmul.f32 %v491_v32, %v491_v32 }
 0x104   : > { %607 = vst [vmem:[%s1072_s11 + $0xc8] sm:$0xff] %v1153_v33  ;;  %v668_v18 = vmul.f32 %v1094_v38, %v1094_v38  ;;  %v669_v19 = vmul.f32 %v1076_v27, %v1076_v27  ;;  %v670_v24 = vmul.f32 %v1087_v35, %v1087_v35 }
 0x105   : > { %v623_v40 = vadd.f32 %v622_v36, %v496_v12  ;;  %v691_v41 = vadd.f32 %v690_v34, %v660_v37  ;;  %v905_v42 = vpop.f32.mrb[12].mxu0  ;;  %v921_v43 = vpop.f32.mrb[12].mxu1  ;;  %v672_v34 = vmul.f32 %v1125_v2, %v1125_v2 }
 0x106   : > { %v512_v45 = vadd.f32 %v905_v42, %v1067_v22  ;;  %v503_v46 = vpop.f32.mrb[13].mxu0  ;;  %v1160_v47 = vadd.f32 %v921_v43, %v1067_v22  ;;  %v567_v48 = vpop.f32.mrb[13].mxu1 }
 0x107   : > { %v692_v49 = vadd.f32 %v691_v41, %v661_v39  ;;  %v504_v51 = vadd.f32 %v1067_v22, %v503_v46  ;;  %v624_v52 = vadd.f32 %v623_v40, %v499_v23  ;;  %v906_v53 = vpop.f32.mrb[14].mxu0  ;;  %v1164_v54 = vadd.f32 %v1067_v22, %v567_v48  ;;  %v922_v55 = vpop.f32.mrb[14].mxu1 }
 0x108   : > { %596 = vst [vmem:[%s1072_s11 + $0x70] sm:$0xff] %v512_v45  ;;  %v515_v57 = vadd.f32 %v906_v53, %v1067_v22  ;;  %v506_v58 = vpop.f32.mrb[15].mxu0  ;;  %612 = vst [vmem:[%s1072_s11 + $0xf0] sm:$0xff] %v1160_v47  ;;  %v1171_v59 = vadd.f32 %v922_v55, %v1067_v22  ;;  %v570_v61 = vpop.f32.mrb[15].mxu1  ;;  %v665_v7 = vmul.f32 %v512_v45, %v512_v45 }
 0x109   : > { %594 = vst [vmem:[%s1072_s11 + $0x60] sm:$0xff] %v504_v51  ;;  %v625_v62 = vadd.f32 %v624_v52, %v504_v51  ;;  %v663_v63 = vmul.f32 %v504_v51, %v504_v51  ;;  %v693_v0 = vadd.f32 %v692_v49, %v662_v44  ;;  %v507_v1 = vadd.f32 %v1067_v22, %v506_v58 }
 0x10a   : > { %610 = vst [vmem:[%s1072_s11 + $0xe0] sm:$0xff] %v1164_v54  ;;  %597 = vst [vmem:[%s1072_s11 + $0x78] sm:$0xff] %v515_v57  ;;  %v571_v3 = vadd.f32 %v1067_v22, %v570_v61  ;;  %v666_v10 = vmul.f32 %v515_v57, %v515_v57  ;;  %v676_v44 = vmul.f32 %v1153_v33, %v1153_v33 }
 0x10b   : > { %613 = vst [vmem:[%s1072_s11 + $0xf8] sm:$0xff] %v1171_v59  ;;  %v694_v4 = vadd.f32 %v693_v0, %v663_v63  ;;  %595 = vst [vmem:[%s1072_s11 + $0x68] sm:$0xff] %v507_v1  ;;  %v626_v5 = vadd.f32 %v625_v62, %v507_v1  ;;  %v664_v6 = vmul.f32 %v507_v1, %v507_v1 }
 0x10c   : > { %611 = vst [vmem:[%s1072_s11 + $0xe8] sm:$0xff] %v571_v3  ;;  %v679_v49 = vmul.f32 %v1164_v54, %v1164_v54  ;;  %v680_v55 = vmul.f32 %v571_v3, %v571_v3  ;;  %v682_v61 = vmul.f32 %v1171_v59, %v1171_v59 }
 0x10d   : > { %v627_v8 = vadd.f32 %v626_v5, %v512_v45  ;;  %v695_v9 = vadd.f32 %v694_v4, %v664_v6 }
 0x10f   : > { %v696_v11 = vadd.f32 %v695_v9, %v665_v7  ;;  %v628_v12 = vadd.f32 %v627_v8, %v515_v57 }
 0x111   : > { %v629_v15 = vadd.f32 %v628_v12, %v1080_v31  ;;  %v697_v16 = vadd.f32 %v696_v11, %v666_v10  ;;  %v671_v31 = vmul.f32 %v1108_v56, %v1108_v56 }
 0x113   : > { %v698_v17 = vadd.f32 %v697_v16, %v667_v13  ;;  %v630_v22 = vadd.f32 %v629_v15, %v1094_v38 }
 0x115   : > { %v631_v21 = vadd.f32 %v630_v22, %v1076_v27  ;;  %v699_v23 = vadd.f32 %v698_v17, %v668_v18  ;;  %v673_v27 = vmul.f32 %v1104_v50, %v1104_v50 }
 0x117   : > { %v700_v26 = vadd.f32 %v699_v23, %v669_v19  ;;  %v632_v28 = vadd.f32 %v631_v21, %v1087_v35  ;;  %v674_v35 = vmul.f32 %v1115_v60, %v1115_v60 }
 0x119   : > { %v633_v29 = vadd.f32 %v632_v28, %v1108_v56  ;;  %v701_v30 = vadd.f32 %v700_v26, %v670_v24  ;;  %v675_v56 = vmul.f32 %v1136_v20, %v1136_v20 }
 0x11b   : > { %v702_v32 = vadd.f32 %v701_v30, %v671_v31  ;;  %v634_v38 = vadd.f32 %v633_v29, %v1125_v2 }
 0x11d   : > { %v635_v36 = vadd.f32 %v634_v38, %v1104_v50  ;;  %v703_v37 = vadd.f32 %v702_v32, %v672_v34  ;;  %v677_v50 = vmul.f32 %v1132_v14, %v1132_v14 }
 0x11f   : > { %v704_v39 = vadd.f32 %v703_v37, %v673_v27  ;;  %v636_v40 = vadd.f32 %v635_v36, %v1115_v60  ;;  %v678_v60 = vmul.f32 %v1143_v25, %v1143_v25 }
 0x121   : > { %v637_v41 = vadd.f32 %v636_v40, %v1136_v20  ;;  %v705_v42 = vadd.f32 %v704_v39, %v674_v35 }
 0x123   : > { %v706_v43 = vadd.f32 %v705_v42, %v675_v56  ;;  %v638_v2 = vadd.f32 %v637_v41, %v1153_v33 }
 0x125   : > { %v639_v45 = vadd.f32 %v638_v2, %v1132_v14  ;;  %v707_v46 = vadd.f32 %v706_v43, %v676_v44  ;;  %v681_v14 = vmul.f32 %v1160_v47, %v1160_v47 }
 0x127   : > { %v708_v48 = vadd.f32 %v707_v46, %v677_v50  ;;  %v640_v20 = vadd.f32 %v639_v45, %v1143_v25 }
 0x129   : > { %v641_v51 = vadd.f32 %v640_v20, %v1164_v54  ;;  %v709_v52 = vadd.f32 %v708_v48, %v678_v60 }
 0x12b   : > { %v710_v33 = vadd.f32 %v709_v52, %v679_v49  ;;  %v642_v53 = vadd.f32 %v641_v51, %v571_v3 }
 0x12d   : > { %v643_v57 = vadd.f32 %v642_v53, %v1160_v47  ;;  %v711_v58 = vadd.f32 %v710_v33, %v680_v55 }
 0x12f   : > { %v644_v25 = vadd.f32 %v643_v57, %v1171_v59  ;;  %v712_v62 = vadd.f32 %v711_v58, %v681_v14 }
 0x131   : > { %v645_v63 = vrot.slane %v644_v25, 4  ;;  %v713_v0 = vadd.f32 %v712_v62, %v682_v61 }
 0x133   : > { %v646_v54 = vadd.f32 %v645_v63, %v644_v25  ;;  %v714_v1 = vrot.slane %v713_v0, 4 }
 0x135   : > { %v647_v4 = vrot.slane %v646_v54, 2  ;;  %v715_v5 = vadd.f32 %v714_v1, %v713_v0 }
 0x137   : > { %v648_v3 = vadd.f32 %v647_v4, %v646_v54  ;;  %v716_v6 = vrot.slane %v715_v5, 2 }
 0x139   : > { %v649_v7 = vrot.slane %v648_v3, 1  ;;  %v717_v8 = vadd.f32 %v716_v6, %v715_v5 }
 0x13b   : > { %v718_v47 = vrot.slane %v717_v8, 1  ;;  %v650_v59 = vadd.f32 %v649_v7, %v648_v3 }
 0x13d   : > { %v719_v9 = vadd.f32 %v718_v47, %v717_v8 }
 0x13f   : > { %v721_v10 = vsel %vm720_vm2, %v650_v59, %v719_v9 }
 0x140   : > { %722 = vst [vmem:[%s211_s17] sm:$0x3] %v721_v10 }
 0x141 PF: > { %s15_s15 = sadd.s32 1, %s970_s15  }
 0x142   : > { %p12_p5 = scmp.ge.s32.totalorder %s15_s15, 4  }
 0x144   :  { %14 = sbr.rel (!%p12_p5) target bundleno = 1 (0x1), region = 74 }

</bundles_post_ra>
